<compile_context>
chip_gen: v7x
topology: tpu7x:2x2x1
jax: 0.10.0
libtpu: 0.0.40
codegen_flags: <defaults>
</compile_context>

<pallas_src>
import functools

import jax
import jax.numpy as jnp
from jax.experimental import pallas as pl
from jax.experimental.pallas import tpu as pltpu

BN_EPS = 1e-5
LANE = 128      # vreg lane width: pad all feature dims to this
SUBLANE = 8     # f32 sublane height: bias row slab padding


def _round_up(n, m):
    return (n + m - 1) // m * m


# ----------------------------------------------------------------------------
# Kernel
# ----------------------------------------------------------------------------
def fcnet_kernel(x_ref, p_ref, out_ref, *, num_blocks, p_dim, batch):
    """x_ref: (B, P) f32; p_ref: (L, P+8, P) packed [W ; b ; pad]; out_ref: (B, P)."""
    inv_b = jnp.float32(1.0 / batch)
    h = x_ref[...]                               # (B, P), zero-padded lanes

    # Hidden blocks: Linear -> ReLU -> BatchNorm1d (train mode, gamma=1, beta=0).
    for l in range(num_blocks):                  # unrolled at trace time
        w = p_ref[l, :p_dim, :]                  # (P, P)
        b = p_ref[l, p_dim:p_dim + 1, :]         # (1, P), added once per block
        z = jnp.dot(h, w, preferred_element_type=jnp.float32) + b
        z = jnp.maximum(z, 0.0)                  # ReLU
        # One-pass BN stats: E[z] and E[z^2] from a single read of z.
        mean = jnp.sum(z, axis=0, keepdims=True) * inv_b
        ex2 = jnp.sum(z * z, axis=0, keepdims=True) * inv_b
        var = jnp.maximum(ex2 - mean * mean, 0.0)
        h = (z - mean) * jax.lax.rsqrt(var + BN_EPS)
        # Padded lanes: W cols/bias are zero -> z=0 -> mean=var=0 -> h stays 0.

    # Final Linear (no activation / BN).
    w = p_ref[num_blocks, :p_dim, :]
    b = p_ref[num_blocks, p_dim:p_dim + 1, :]
    out = jnp.dot(h, w, preferred_element_type=jnp.float32) + b
    out_ref[...] = out.astype(out_ref.dtype)     # (B, P): lane-dense store


# ----------------------------------------------------------------------------
# Wrapper
# ----------------------------------------------------------------------------
def pack_params(layers, p_dim):
    """Pack [(W (in,out), b (out,)), ...] into one (L, P+8, P) f32 slab."""
    slabs = []
    for w, b in layers:
        fin, fout = w.shape
        slab = jnp.zeros((p_dim + SUBLANE, p_dim), jnp.float32)
        slab = slab.at[:fin, :fout].set(w.astype(jnp.float32))
        slab = slab.at[p_dim, :fout].set(b.reshape(-1).astype(jnp.float32))
        slabs.append(slab)
    return jnp.stack(slabs)                      # (L, P+8, P)


def fcnet_forward(x, layers, nr_labels):
    """x: (B, input_features) f32. layers: list of (W (in,out), b (out,)) incl. final."""
    B, f_in = x.shape
    dims = [f_in] + [w.shape[1] for w, _ in layers]
    p_dim = _round_up(max(dims), LANE)           # 128 for this config

    # Lane-dense, zero-padded activations and packed parameters.
    x_p = jnp.zeros((B, p_dim), jnp.float32).at[:, :f_in].set(x)
    packed = pack_params(layers, p_dim)

    kernel = functools.partial(
        fcnet_kernel, num_blocks=len(layers) - 1, p_dim=p_dim, batch=B)
    vmem = pl.BlockSpec(memory_space=pltpu.MemorySpace.VMEM)

    out_p = pl.pallas_call(
        kernel,
        out_shape=jax.ShapeDtypeStruct((B, p_dim), jnp.float32),
        in_specs=[vmem, vmem],                   # 2 DMAs total: x + packed params
        out_specs=vmem,
        compiler_params=pltpu.CompilerParams(
            # Tiny working set (<1 MiB); well under v7x's 64 MiB physical VMEM.
            vmem_limit_bytes=32 * 1024 * 1024),
    )(x_p, packed)
    return out_p[:, :nr_labels]                  # drop padded logit lanes


# ----------------------------------------------------------------------------
# Init + pure-JAX reference
# ----------------------------------------------------------------------------
def init_params(key, input_features, num_units_1, num_units_2, nr_labels):
    """nn.Linear default init U(-1/sqrt(fan_in), 1/sqrt(fan_in)); W as (in, out)."""
    def linear(k, fan_in, fan_out):
        kw, kb = jax.random.split(k)
        bound = 1.0 / jnp.sqrt(fan_in)
        w = jax.random.uniform(kw, (fan_in, fan_out), jnp.float32, -bound, bound)
        b = jax.random.uniform(kb, (fan_out,), jnp.float32, -bound, bound)
        return w, b

    k1, k2, k3 = jax.random.split(key, 3)
    return [linear(k1, input_features, num_units_1),
            linear(k2, num_units_1, num_units_2),
            linear(k3, num_units_2, nr_labels)]


def fcnet_reference(x, layers):
    *blocks, (wf, bf) = layers
    h = x
    for w, b in blocks:
        z = jnp.maximum(h @ w + b, 0.0)
        mean = jnp.mean(z, axis=0, keepdims=True)
        var = jnp.mean((z - mean) ** 2, axis=0, keepdims=True)
        h = (z - mean) / jnp.sqrt(var + BN_EPS)
    return h @ wf + bf


if __name__ == "__main__":
    # Small shapes consistent with the module: batch=8, input_features=32,
    # num_units_1=num_units_2=32, nr_labels=4.
    B, F_IN, U1, U2, LABELS = 8, 32, 32, 32, 4

    key = jax.random.PRNGKey(0)
    k_x, k_p = jax.random.split(key)
    x = jax.random.normal(k_x, (B, F_IN), dtype=jnp.float32)
    layers = init_params(k_p, F_IN, U1, U2, LABELS)

    out = fcnet_forward(x, layers, LABELS)
    out = jax.block_until_ready(out)

    ref = fcnet_reference(x, layers)
    assert out.shape == (B, LABELS)
    assert jnp.allclose(out, ref, atol=1e-4, rtol=1e-4), "mismatch vs reference"

    print("KERNEL_OK")
</pallas_src>

<mosaic_0001>
module attributes {stable_mosaic.version = 11 : i64} {
  func.func @fcnet_kernel(%arg0: memref<8x128xf32, #tpu.memory_space<vmem>>, %arg1: memref<3x136x128xf32, #tpu.memory_space<vmem>>, %arg2: memref<8x128xf32, #tpu.memory_space<vmem>>) attributes {dimension_semantics = [], scalar_prefetch = 0 : i64, scratch_operands = 0 : i64, tpu.core_type = #tpu.core_type<tc>} {
    %c0 = arith.constant 0 : index
    %c0_0 = arith.constant 0 : index
    %0 = vector.load %arg0[%c0, %c0_0] : memref<8x128xf32, #tpu.memory_space<vmem>>, vector<8x128xf32>
    %c0_1 = arith.constant 0 : index
    %c0_2 = arith.constant 0 : index
    %c0_3 = arith.constant 0 : index
    %1 = vector.load %arg1[%c0_1, %c0_2, %c0_3] : memref<3x136x128xf32, #tpu.memory_space<vmem>>, vector<1x128x128xf32>
    %2 = vector.shape_cast %1 : vector<1x128x128xf32> to vector<128x128xf32>
    %c0_4 = arith.constant 0 : index
    %c128 = arith.constant 128 : index
    %c0_5 = arith.constant 0 : index
    %3 = vector.load %arg1[%c0_4, %c128, %c0_5] : memref<3x136x128xf32, #tpu.memory_space<vmem>>, vector<1x1x128xf32>
    %4 = vector.shape_cast %3 : vector<1x1x128xf32> to vector<1x128xf32>
    %cst = arith.constant dense<0.000000e+00> : vector<8x128xf32>
    %5 = tpu.matmul %0, %2, %cst {dimension_numbers = #tpu.dot_dimension_numbers<[1], [0], [0], [1], [0, 0, 1, 1], [], []>} : vector<8x128xf32>, vector<128x128xf32>, vector<8x128xf32> -> vector<8x128xf32>
    %6 = vector.broadcast %4 : vector<1x128xf32> to vector<8x128xf32>
    %7 = arith.addf %5, %6 : vector<8x128xf32>
    %cst_6 = arith.constant 0.000000e+00 : f32
    %8 = vector.broadcast %cst_6 : f32 to vector<8x128xf32>
    %9 = arith.maximumf %7, %8 : vector<8x128xf32>
    %cst_7 = arith.constant dense<0.000000e+00> : vector<128xf32>
    %10 = vector.multi_reduction <add>, %9, %cst_7 [0] : vector<8x128xf32> to vector<128xf32>
    %11 = vector.shape_cast %10 : vector<128xf32> to vector<1x128xf32>
    %cst_8 = arith.constant 1.250000e-01 : f32
    %12 = vector.broadcast %cst_8 : f32 to vector<1x128xf32>
    %13 = arith.mulf %11, %12 : vector<1x128xf32>
    %14 = arith.mulf %9, %9 : vector<8x128xf32>
    %cst_9 = arith.constant dense<0.000000e+00> : vector<128xf32>
    %15 = vector.multi_reduction <add>, %14, %cst_9 [0] : vector<8x128xf32> to vector<128xf32>
    %16 = vector.shape_cast %15 : vector<128xf32> to vector<1x128xf32>
    %cst_10 = arith.constant 1.250000e-01 : f32
    %17 = vector.broadcast %cst_10 : f32 to vector<1x128xf32>
    %18 = arith.mulf %16, %17 : vector<1x128xf32>
    %19 = arith.mulf %13, %13 : vector<1x128xf32>
    %20 = arith.subf %18, %19 : vector<1x128xf32>
    %cst_11 = arith.constant 0.000000e+00 : f32
    %21 = vector.broadcast %cst_11 : f32 to vector<1x128xf32>
    %22 = arith.maximumf %20, %21 : vector<1x128xf32>
    %23 = vector.broadcast %13 : vector<1x128xf32> to vector<8x128xf32>
    %24 = arith.subf %9, %23 : vector<8x128xf32>
    %cst_12 = arith.constant 9.99999974E-6 : f32
    %25 = vector.broadcast %cst_12 : f32 to vector<1x128xf32>
    %26 = arith.addf %22, %25 : vector<1x128xf32>
    %27 = math.rsqrt %26 : vector<1x128xf32>
    %28 = vector.broadcast %27 : vector<1x128xf32> to vector<8x128xf32>
    %29 = arith.mulf %24, %28 : vector<8x128xf32>
    %c1 = arith.constant 1 : index
    %c0_13 = arith.constant 0 : index
    %c0_14 = arith.constant 0 : index
    %30 = vector.load %arg1[%c1, %c0_13, %c0_14] : memref<3x136x128xf32, #tpu.memory_space<vmem>>, vector<1x128x128xf32>
    %31 = vector.shape_cast %30 : vector<1x128x128xf32> to vector<128x128xf32>
    %c1_15 = arith.constant 1 : index
    %c128_16 = arith.constant 128 : index
    %c0_17 = arith.constant 0 : index
    %32 = vector.load %arg1[%c1_15, %c128_16, %c0_17] : memref<3x136x128xf32, #tpu.memory_space<vmem>>, vector<1x1x128xf32>
    %33 = vector.shape_cast %32 : vector<1x1x128xf32> to vector<1x128xf32>
    %cst_18 = arith.constant dense<0.000000e+00> : vector<8x128xf32>
    %34 = tpu.matmul %29, %31, %cst_18 {dimension_numbers = #tpu.dot_dimension_numbers<[1], [0], [0], [1], [0, 0, 1, 1], [], []>} : vector<8x128xf32>, vector<128x128xf32>, vector<8x128xf32> -> vector<8x128xf32>
    %35 = vector.broadcast %33 : vector<1x128xf32> to vector<8x128xf32>
    %36 = arith.addf %34, %35 : vector<8x128xf32>
    %cst_19 = arith.constant 0.000000e+00 : f32
    %37 = vector.broadcast %cst_19 : f32 to vector<8x128xf32>
    %38 = arith.maximumf %36, %37 : vector<8x128xf32>
    %cst_20 = arith.constant dense<0.000000e+00> : vector<128xf32>
    %39 = vector.multi_reduction <add>, %38, %cst_20 [0] : vector<8x128xf32> to vector<128xf32>
    %40 = vector.shape_cast %39 : vector<128xf32> to vector<1x128xf32>
    %cst_21 = arith.constant 1.250000e-01 : f32
    %41 = vector.broadcast %cst_21 : f32 to vector<1x128xf32>
    %42 = arith.mulf %40, %41 : vector<1x128xf32>
    %43 = arith.mulf %38, %38 : vector<8x128xf32>
    %cst_22 = arith.constant dense<0.000000e+00> : vector<128xf32>
    %44 = vector.multi_reduction <add>, %43, %cst_22 [0] : vector<8x128xf32> to vector<128xf32>
    %45 = vector.shape_cast %44 : vector<128xf32> to vector<1x128xf32>
    %cst_23 = arith.constant 1.250000e-01 : f32
    %46 = vector.broadcast %cst_23 : f32 to vector<1x128xf32>
    %47 = arith.mulf %45, %46 : vector<1x128xf32>
    %48 = arith.mulf %42, %42 : vector<1x128xf32>
    %49 = arith.subf %47, %48 : vector<1x128xf32>
    %cst_24 = arith.constant 0.000000e+00 : f32
    %50 = vector.broadcast %cst_24 : f32 to vector<1x128xf32>
    %51 = arith.maximumf %49, %50 : vector<1x128xf32>
    %52 = vector.broadcast %42 : vector<1x128xf32> to vector<8x128xf32>
    %53 = arith.subf %38, %52 : vector<8x128xf32>
    %cst_25 = arith.constant 9.99999974E-6 : f32
    %54 = vector.broadcast %cst_25 : f32 to vector<1x128xf32>
    %55 = arith.addf %51, %54 : vector<1x128xf32>
    %56 = math.rsqrt %55 : vector<1x128xf32>
    %57 = vector.broadcast %56 : vector<1x128xf32> to vector<8x128xf32>
    %58 = arith.mulf %53, %57 : vector<8x128xf32>
    %c2 = arith.constant 2 : index
    %c0_26 = arith.constant 0 : index
    %c0_27 = arith.constant 0 : index
    %59 = vector.load %arg1[%c2, %c0_26, %c0_27] : memref<3x136x128xf32, #tpu.memory_space<vmem>>, vector<1x128x128xf32>
    %60 = vector.shape_cast %59 : vector<1x128x128xf32> to vector<128x128xf32>
    %c2_28 = arith.constant 2 : index
    %c128_29 = arith.constant 128 : index
    %c0_30 = arith.constant 0 : index
    %61 = vector.load %arg1[%c2_28, %c128_29, %c0_30] : memref<3x136x128xf32, #tpu.memory_space<vmem>>, vector<1x1x128xf32>
    %62 = vector.shape_cast %61 : vector<1x1x128xf32> to vector<1x128xf32>
    %cst_31 = arith.constant dense<0.000000e+00> : vector<8x128xf32>
    %63 = tpu.matmul %58, %60, %cst_31 {dimension_numbers = #tpu.dot_dimension_numbers<[1], [0], [0], [1], [0, 0, 1, 1], [], []>} : vector<8x128xf32>, vector<128x128xf32>, vector<8x128xf32> -> vector<8x128xf32>
    %64 = vector.broadcast %62 : vector<1x128xf32> to vector<8x128xf32>
    %65 = arith.addf %63, %64 : vector<8x128xf32>
    %c0_32 = arith.constant 0 : index
    %c0_33 = arith.constant 0 : index
    %66 = vector.load %arg2[%c0_32, %c0_33] : memref<8x128xf32, #tpu.memory_space<vmem>>, vector<8x128xf32>
    tpu.vector_store %arg2[%c0_32, %c0_33], %65 {strides = array<i32>} : memref<8x128xf32, #tpu.memory_space<vmem>>, vector<8x128xf32>,
    return
  }
}

</mosaic_0001>

<bundles_post_ra>
// kernel: tpu_custom_call.1
= control target key start
LH: loop header
LB: loop body
LE: loop exit
PB: predicated region body
PF: predicated region fallthrough
CT: control target
= control target key end

     0   :  { %7 = vsyncpa [#allocation3], 0  ;;  %s785_s0 = inlined_call_operand.hbm [shape: f32[8,128], index: 0, kind: input, shape index: {}]   ;;  %s786_s1 = inlined_call_operand.hbm [shape: f32[3,136,128], index: 1, kind: input, shape index: {}]   ;;  %s787_s2 = inlined_call_operand.hbm [shape: f32[8,128], index: 2, kind: output, shape index: {}]  }
   0x1   :  { %8 = vsyncpa [#allocation6], 0 }
   0x2   :  { %9 = vsyncpa [#allocation4], 0  ;;  %s692_s9 = smov [#allocation2]   ;;  %s693_s11 = smov [#allocation5]  }
   0x3   :  { %s16_s10 = sshll.u32 %s692_s9, 4  ;;  %s25_s12 = sshll.u32 %s693_s11, 4  ;;  %s17_s10 = int_to_ptr.vmem [resolvable:$true] %s16_s10  ;;  %s715_s12 = int_to_ptr.vmem [resolvable:$true] %s25_s12 }
   0x4   :  { %s620_s15 = scalar_lea.hbm %s785_s0, 128 }
   0x5   :  { %p621_p0 = scmp.ne.s32.totalorder %s785_s0, %s620_s15  ;;  %p624_p1 = scmp.lt.u32.totalorder %s620_s15, %s785_s0 }
   0x7   :  { %p626_p2 = pnand %p624_p1, %p621_p0 }
   0x9   :  { %629 = shalt.err (!%p626_p2)
}
   0xa   :  { %s630_s20 = scalar_lea.vmem %s17_s10, 128  ;;  %p635_p4 = scmp.lt.s32.totalorder %s17_s10, %s17_s10 }
   0xb   :  { %p631_p3 = scmp.ne.s32.totalorder %s17_s10, %s630_s20  ;;  %p636_p5 = scmp.lt.s32.totalorder %s630_s20, %s630_s20 }
   0xd   :  { %p637_p6 = por %p636_p5, %p635_p4 }
   0xf   :  { %p638_p7 = pnand %p637_p6, %p631_p3 }
  0x11   :  { %641 = shalt.err (!%p638_p7)
}
  0x12   :  { %19 = dma.hbm_to_vmem [thread:$0]  %s785_s0, 128, %s17_s10, [#allocation3]  }
  0x13   :  { %s642_s25 = scalar_lea.hbm %s786_s1, 6528 }
  0x14   :  { %p643_p8 = scmp.ne.s32.totalorder %s786_s1, %s642_s25  ;;  %p646_p9 = scmp.lt.u32.totalorder %s642_s25, %s786_s1 }
  0x16   :  { %p648_p10 = pnand %p646_p9, %p643_p8 }
  0x18   :  { %651 = shalt.err (!%p648_p10)
}
  0x19   :  { %s652_s30 = scalar_lea.vmem %s715_s12, 6528  ;;  %p657_p12 = scmp.lt.s32.totalorder %s715_s12, %s715_s12 }
  0x1a   :  { %p653_p11 = scmp.ne.s32.totalorder %s715_s12, %s652_s30  ;;  %p658_p13 = scmp.lt.s32.totalorder %s652_s30, %s652_s30 }
  0x1c   :  { %p659_p0 = por %p658_p13, %p657_p12 }
  0x1e   :  { %p660_p1 = pnand %p659_p0, %p653_p11 }
  0x20   :  { %663 = shalt.err (!%p660_p1)
}
  0x21   :  { %s694_s0 = smov 128   ;;  %s695_s3 = smov 8  }
  0x22   :  { %31 = dma.hbm_to_vmem [thread:$0]  %s786_s1, 6528, %s715_s12, [#allocation6], %s694_s0, %s694_s0, %s695_s3  }
  0x23   :  { %686 = dma.done.wait [#allocation3], 128  }
  0x24   :  { %687 = vsyncadd [#allocation3], 4294967168 }
  0x25   :  { %688 = dma.done.wait [#allocation6], 6528  }
  0x26   :  { %689 = vsyncadd [#allocation6], 4294960768  ;;  %v696_v0 = vmov 0.0|0.0   ;;  %vm697_vm0 = vmmov 0   ;;  %v698_v1 = vmov 0.0   ;;  %v39_v2 = vld [vmem:[#allocation5] sm:$0xff] }
  0x27   :  { %536 = vmatprep.subr.bf16.mxu0 %v696_v0  ;;  %463 = vmatprep.mubr.msk.f32.mxu0 %vm697_vm0, %v698_v1  ;;  %v40_v3 = vld [vmem:[#allocation5 + $0x8] sm:$0xff]  ;;  %v41_v4 = vld [vmem:[#allocation5 + $0x10] sm:$0xff]  ;;  %v42_v6 = vld [vmem:[#allocation5 + $0x18] sm:$0xff]  ;;  %s699_s1 = smov [#allocation7]  }
  0x28   :  { %560 = vmatprep.subr.bf16.mxu1 %v696_v0  ;;  %498 = vmatprep.mubr.msk.f32.mxu1 %vm697_vm0, %v698_v1  ;;  %v537_v5 = vpack.c.bf16 %v40_v3, %v39_v2  ;;  %v540_v7 = vpack.c.bf16 %v42_v6, %v41_v4  ;;  %v43_v8 = vld [vmem:[#allocation5 + $0x20] sm:$0xff]  ;;  %v44_v9 = vld [vmem:[#allocation5 + $0x28] sm:$0xff]  ;;  %v45_v11 = vld [vmem:[#allocation5 + $0x30] sm:$0xff]  ;;  %s367_s6 = sshll.u32 %s699_s1, 4  ;;  %s368_s6 = int_to_ptr.vmem [resolvable:$true] %s367_s6 }
  0x29   :  { %v543_v10 = vpack.c.bf16 %v44_v9, %v43_v8  ;;  %v46_v12 = vld [vmem:[#allocation5 + $0x38] sm:$0xff]  ;;  %v47_v14 = vld [vmem:[#allocation5 + $0x40] sm:$0xff]  ;;  %v48_v15 = vld [vmem:[#allocation5 + $0x48] sm:$0xff]  ;;  %s664_s7 = scalar_lea.vmem %s368_s6, 128  ;;  %p669_p3 = scmp.lt.s32.totalorder %s368_s6, %s368_s6 }
  0x2a   :  { %538 = vmatpush3.bf16.msra.mxu0 %v537_v5  ;;  %v546_v13 = vpack.c.bf16 %v46_v12, %v45_v11  ;;  %v549_v16 = vpack.c.bf16 %v48_v15, %v47_v14  ;;  %v49_v17 = vld [vmem:[#allocation5 + $0x50] sm:$0xff]  ;;  %v50_v18 = vld [vmem:[#allocation5 + $0x58] sm:$0xff]  ;;  %v51_v20 = vld [vmem:[#allocation5 + $0x60] sm:$0xff]  ;;  %p665_p2 = scmp.ne.s32.totalorder %s368_s6, %s664_s7  ;;  %p670_p4 = scmp.lt.s32.totalorder %s664_s7, %s664_s7 }
  0x2b   :  { %539 = vmatprep.subr.bf16.mxu0 %v696_v0  ;;  %v552_v19 = vpack.c.bf16 %v50_v18, %v49_v17  ;;  %v52_v21 = vld [vmem:[#allocation5 + $0x68] sm:$0xff]  ;;  %v53_v23 = vld [vmem:[#allocation5 + $0x70] sm:$0xff]  ;;  %v54_v24 = vld [vmem:[#allocation5 + $0x78] sm:$0xff] }
  0x2c   :  { %v555_v22 = vpack.c.bf16 %v52_v21, %v51_v20  ;;  %v558_v25 = vpack.c.bf16 %v54_v24, %v53_v23  ;;  %v38_v26 = vld [vmem:[#allocation2] sm:$0xff]  ;;  %v154_v27 = vld [vmem:[#allocation5 + $0x88] sm:$0xff]  ;;  %v155_v28 = vld [vmem:[#allocation5 + $0x90] sm:$0xff]  ;;  %p671_p5 = por %p670_p4, %p669_p3 }
  0x2d   :  { %v561_v29 = vpack.c.bf16 %v155_v28, %v154_v27  ;;  %v156_v30 = vld [vmem:[#allocation5 + $0x98] sm:$0xff]  ;;  %v157_v31 = vld [vmem:[#allocation5 + $0xa0] sm:$0xff]  ;;  %v158_v33 = vld [vmem:[#allocation5 + $0xa8] sm:$0xff] }
  0x2e   :  { %541 = vmatpush3.bf16.msra.mxu0 %v540_v7  ;;  %v564_v32 = vpack.c.bf16 %v157_v31, %v156_v30  ;;  %v159_v34 = vld [vmem:[#allocation5 + $0xb0] sm:$0xff]  ;;  %v160_v36 = vld [vmem:[#allocation5 + $0xb8] sm:$0xff]  ;;  %v161_v37 = vld [vmem:[#allocation5 + $0xc0] sm:$0xff]  ;;  %p672_p6 = pnand %p671_p5, %p665_p2 }
  0x2f   :  { %542 = vmatprep.subr.bf16.mxu0 %v696_v0  ;;  %562 = vmatpush3.bf16.msra.mxu1 %v561_v29  ;;  %v567_v35 = vpack.c.bf16 %v159_v34, %v158_v33  ;;  %v570_v38 = vpack.c.bf16 %v161_v37, %v160_v36  ;;  %v162_v39 = vld [vmem:[#allocation5 + $0xc8] sm:$0xff]  ;;  %v163_v40 = vld [vmem:[#allocation5 + $0xd0] sm:$0xff]  ;;  %v164_v42 = vld [vmem:[#allocation5 + $0xd8] sm:$0xff] }
  0x30   :  { %563 = vmatprep.subr.bf16.mxu1 %v696_v0  ;;  %v573_v41 = vpack.c.bf16 %v163_v40, %v162_v39  ;;  %v165_v43 = vld [vmem:[#allocation5 + $0xe0] sm:$0xff]  ;;  %v166_v45 = vld [vmem:[#allocation5 + $0xe8] sm:$0xff]  ;;  %v167_v46 = vld [vmem:[#allocation5 + $0xf0] sm:$0xff] }
  0x31   :  { %v576_v44 = vpack.c.bf16 %v165_v43, %v164_v42  ;;  %v579_v47 = vpack.c.bf16 %v167_v46, %v166_v45  ;;  %v168_v48 = vld [vmem:[#allocation5 + $0xf8] sm:$0xff]  ;;  %v169_v49 = vld [vmem:[#allocation5 + $0x100] sm:$0xff]  ;;  %v269_v15 = vld [vmem:[#allocation5 + $0x110] sm:$0xff] }
  0x32   :  { %544 = vmatpush3.bf16.msra.mxu0 %v543_v10  ;;  %v582_v50 = vpack.c.bf16 %v169_v49, %v168_v48  ;;  %v377_v51 = vld [vmem:[#allocation5 + $0x80] ss:$0 sm:$0xff]  ;;  %v273_v21 = vld [vmem:[#allocation5 + $0x130] sm:$0xff]  ;;  %v278_v28 = vld [vmem:[#allocation5 + $0x158] sm:$0xff] }
  0x33   :  { %545 = vmatprep.subr.bf16.mxu0 %v696_v0  ;;  %565 = vmatpush3.bf16.msra.mxu1 %v564_v32  ;;  %v271_v18 = vld [vmem:[#allocation5 + $0x120] sm:$0xff]  ;;  %v277_v27 = vld [vmem:[#allocation5 + $0x150] sm:$0xff]  ;;  %v280_v31 = vld [vmem:[#allocation5 + $0x168] sm:$0xff] }
  0x34   :  { %566 = vmatprep.subr.bf16.mxu1 %v696_v0  ;;  %v275_v24 = vld [vmem:[#allocation5 + $0x140] sm:$0xff]  ;;  %v597_v29 = vpack.c.bf16 %v278_v28, %v277_v27  ;;  %v281_v33 = vld [vmem:[#allocation5 + $0x170] sm:$0xff]  ;;  %v282_v34 = vld [vmem:[#allocation5 + $0x178] sm:$0xff] }
  0x35   :  { %v279_v30 = vld [vmem:[#allocation5 + $0x160] sm:$0xff]  ;;  %v284_v37 = vld [vmem:[#allocation5 + $0x188] sm:$0xff] }
  0x36   :  { %547 = vmatpush3.bf16.msra.mxu0 %v546_v13  ;;  %v600_v32 = vpack.c.bf16 %v280_v31, %v279_v30  ;;  %v283_v36 = vld [vmem:[#allocation5 + $0x180] sm:$0xff]  ;;  %v378_v39 = vld [vmem:[#allocation5 + $0x108] ss:$0 sm:$0xff] }
  0x37   :  { %548 = vmatprep.subr.bf16.mxu0 %v696_v0  ;;  %568 = vmatpush3.bf16.msra.mxu1 %v567_v35  ;;  %v603_v35 = vpack.c.bf16 %v282_v34, %v281_v33 }
  0x38   :  { %569 = vmatprep.subr.bf16.mxu1 %v696_v0 }
  0x3a   :  { %550 = vmatpush3.bf16.msra.mxu0 %v549_v16  ;;  %v270_v16 = vld [vmem:[#allocation5 + $0x118] sm:$0xff] }
  0x3b   :  { %551 = vmatprep.subr.bf16.mxu0 %v696_v0  ;;  %571 = vmatpush3.bf16.msra.mxu1 %v570_v38  ;;  %v585_v17 = vpack.c.bf16 %v270_v16, %v269_v15  ;;  %v606_v38 = vpack.c.bf16 %v284_v37, %v283_v36 }
  0x3c   :  { %572 = vmatprep.subr.bf16.mxu1 %v696_v0 }
  0x3e   :  { %553 = vmatpush3.bf16.msra.mxu0 %v552_v19  ;;  %v272_v19 = vld [vmem:[#allocation5 + $0x128] sm:$0xff] }
  0x3f   :  { %554 = vmatprep.subr.bf16.mxu0 %v696_v0  ;;  %574 = vmatpush3.bf16.msra.mxu1 %v573_v41  ;;  %v588_v20 = vpack.c.bf16 %v272_v19, %v271_v18 }
  0x40   :  { %575 = vmatprep.subr.bf16.mxu1 %v696_v0 }
  0x42   :  { %556 = vmatpush3.bf16.msra.mxu0 %v555_v22  ;;  %v274_v22 = vld [vmem:[#allocation5 + $0x138] sm:$0xff] }
  0x43   :  { %557 = vmatprep.subr.bf16.mxu0 %v696_v0  ;;  %577 = vmatpush3.bf16.msra.mxu1 %v576_v44  ;;  %v591_v23 = vpack.c.bf16 %v274_v22, %v273_v21 }
  0x44   :  { %578 = vmatprep.subr.bf16.mxu1 %v696_v0 }
  0x46   :  { %559 = vmatpush3.bf16.msra.mxu0 %v558_v25  ;;  %v276_v25 = vld [vmem:[#allocation5 + $0x148] sm:$0xff] }
  0x47   :  { %584 = vmatprep.subr.bf16.mxu0 %v696_v0  ;;  %580 = vmatpush3.bf16.msra.mxu1 %v579_v47 }
  0x48   :  { %581 = vmatprep.subr.bf16.mxu1 %v696_v0 }
  0x49   :  { %464 = vmatmul.mubr.f32.vlgmr.msra.gmra.mrb[0].mxu0 %v38_v26  ;;  %v594_v26 = vpack.c.bf16 %v276_v25, %v275_v24 }
  0x4a   :  { %533 = vmatprep.mubr.msk.f32.mxu0 %vm697_vm0, %v698_v1  ;;  %586 = vmatpush3.bf16.msra.mxu0 %v585_v17 }
  0x4b   :  { %583 = vmatpush3.bf16.msra.mxu1 %v582_v50  ;;  %587 = vmatprep.subr.bf16.mxu0 %v696_v0 }
  0x4e   :  { %589 = vmatpush3.bf16.msra.mxu0 %v588_v20 }
  0x4f   :  { %590 = vmatprep.subr.bf16.mxu0 %v696_v0 }
  0x52   :  { %592 = vmatpush3.bf16.msra.mxu0 %v591_v23 }
  0x53   :  { %593 = vmatprep.subr.bf16.mxu0 %v696_v0 }
  0x56   :  { %595 = vmatpush3.bf16.msra.mxu0 %v594_v26 }
  0x57   :  { %596 = vmatprep.subr.bf16.mxu0 %v696_v0 }
  0x5a   :  { %598 = vmatpush3.bf16.msra.mxu0 %v597_v29 }
  0x5b   :  { %599 = vmatprep.subr.bf16.mxu0 %v696_v0 }
  0x5e   :  { %601 = vmatpush3.bf16.msra.mxu0 %v600_v32 }
  0x5f   :  { %602 = vmatprep.subr.bf16.mxu0 %v696_v0 }
  0x62   :  { %604 = vmatpush3.bf16.msra.mxu0 %v603_v35 }
  0x63   :  { %605 = vmatprep.subr.bf16.mxu0 %v696_v0 }
  0x66   :  { %607 = vmatpush3.bf16.msra.mxu0 %v606_v38 }
 0x11c   :  { %v126_v52 = vpop.f32.mrb[0].mxu0 }
 0x11d   :  { %v127_v53 = vadd.f32 %v377_v51, %v126_v52  ;;  %v465_v54 = vpop.f32.mrb[1].mxu0 }
 0x11f   :  { %v130_v55 = vmax.f32 %v127_v53, 0.0 }
 0x121   :  { %v131_v56 = vrot.slane %v130_v55, 4  ;;  %v138_v57 = vmul.f32 %v130_v55, %v130_v55 }
 0x123   :  { %v132_v58 = vadd.f32 %v131_v56, %v130_v55  ;;  %v139_v59 = vrot.slane %v138_v57, 4 }
 0x125   :  { %v133_v60 = vrot.slane %v132_v58, 2  ;;  %v140_v61 = vadd.f32 %v139_v59, %v138_v57 }
 0x127   :  { %v141_v62 = vrot.slane %v140_v61, 2  ;;  %v134_v63 = vadd.f32 %v133_v60, %v132_v58 }
 0x129   :  { %v142_v1 = vadd.f32 %v141_v62, %v140_v61  ;;  %v135_v2 = vrot.slane %v134_v63, 1 }
 0x12b   :  { %v143_v3 = vrot.slane %v142_v1, 1  ;;  %v136_v4 = vadd.f32 %v135_v2, %v134_v63  ;;  %v379_v2 = vld [vmem:[#allocation5 + $0x190] ss:$0 sm:$0xff] }
 0x12d   :  { %v137_v5 = vmul.f32 0.125, %v136_v4  ;;  %v144_v6 = vadd.f32 %v143_v3, %v142_v1 }
 0x12f   :  { %v145_v7 = vmul.f32 0.125, %v144_v6  ;;  %v146_v8 = vmul.f32 %v137_v5, %v137_v5  ;;  %v149_v12 = vsub.f32 %v130_v55, %v137_v5 }
 0x131   :  { %v147_v9 = vsub.f32 %v145_v7, %v146_v8 }
 0x133   :  { %v148_v10 = vmax.f32 %v147_v9, 0.0 }
 0x135   :  { %v150_v11 = vadd.f32 1e-05, %v148_v10 }
 0x137   :  { %616 = vrsqrt.f32 %v150_v11 }
 0x141   :  { %v617_v13 = vpop.eup %616 }
 0x142   :  { %v152_v14 = vmul.f32 %v617_v13, %v149_v12 }
 0x144   :  { %499 = vmatmul.mubr.f32.vlgmr.msra.gmra.mrb[0].mxu1 %v152_v14 }
 0x217   :  { %v241_v40 = vpop.f32.mrb[0].mxu1 }
 0x218   :  { %v242_v41 = vadd.f32 %v378_v39, %v241_v40  ;;  %v500_v42 = vpop.f32.mrb[1].mxu1 }
 0x21a   :  { %v245_v43 = vmax.f32 %v242_v41, 0.0 }
 0x21c   :  { %v246_v44 = vrot.slane %v245_v43, 4  ;;  %v253_v45 = vmul.f32 %v245_v43, %v245_v43 }
 0x21e   :  { %v247_v46 = vadd.f32 %v246_v44, %v245_v43  ;;  %v254_v47 = vrot.slane %v253_v45, 4 }
 0x220   :  { %v248_v48 = vrot.slane %v247_v46, 2  ;;  %v255_v49 = vadd.f32 %v254_v47, %v253_v45 }
 0x222   :  { %v249_v50 = vadd.f32 %v248_v48, %v247_v46  ;;  %v256_v51 = vrot.slane %v255_v49, 2 }
 0x224   :  { %v250_v52 = vrot.slane %v249_v50, 1  ;;  %v257_v53 = vadd.f32 %v256_v51, %v255_v49 }
 0x226   :  { %v251_v54 = vadd.f32 %v250_v52, %v249_v50  ;;  %v258_v55 = vrot.slane %v257_v53, 1 }
 0x228   :  { %v252_v56 = vmul.f32 0.125, %v251_v54  ;;  %v259_v0 = vadd.f32 %v258_v55, %v257_v53 }
 0x22a   :  { %v260_v57 = vmul.f32 0.125, %v259_v0  ;;  %v261_v58 = vmul.f32 %v252_v56, %v252_v56  ;;  %v264_v62 = vsub.f32 %v245_v43, %v252_v56 }
 0x22c   :  { %v262_v59 = vsub.f32 %v260_v57, %v261_v58 }
 0x22e   :  { %v263_v60 = vmax.f32 %v262_v59, 0.0 }
 0x230   :  { %v265_v61 = vadd.f32 1e-05, %v263_v60 }
 0x232   :  { %618 = vrsqrt.f32 %v265_v61 }
 0x23c   :  { %v619_v63 = vpop.eup %618 }
 0x23d   :  { %v267_v1 = vmul.f32 %v619_v63, %v264_v62 }
 0x23f   :  { %534 = vmatmul.mubr.f32.vlgmr.msra.gmra.mrb[2].mxu0 %v267_v1 }
 0x312   :  { %v356_v3 = vpop.f32.mrb[2].mxu0 }
 0x313   :  { %v357_v4 = vadd.f32 %v379_v2, %v356_v3  ;;  %v535_v5 = vpop.f32.mrb[3].mxu0 }
 0x315   :  { %360 = vst [vmem:[#allocation7] sm:$0xff] %v357_v4 }
 0x316   :  { %675 = shalt.err (!%p672_p6)
}
 0x317   :  { %s676_s10 = scalar_lea.hbm %s787_s2, 128 }
 0x318   :  { %p677_p7 = scmp.ne.s32.totalorder %s787_s2, %s676_s10  ;;  %p680_p8 = scmp.lt.u32.totalorder %s676_s10, %s787_s2 }
 0x31a   :  { %p682_p9 = pnand %p680_p8, %p677_p7 }
 0x31c   :  { %685 = shalt.err (!%p682_p9)
}
 0x31d   :  { %370 = dma.vmem_to_hbm [thread:$0]  %s368_s6, 128, %s787_s2, [#allocation4]  }
 0x31e   :  { %690 = dma.done.wait [#allocation4], 128  }
 0x31f   :  { %691 = vsyncadd [#allocation4], 4294967168 }
 0x320   :  { %374 = vsyncpa [#allocation3], 1 }
 0x321   :  { %375 = vsyncpa [#allocation6], 1 }
 0x322   :  { %376 = vsyncpa [#allocation4], 1 }

</bundles_post_ra>
